<compile_context>
chip_gen: v7x
topology: tpu7x:2x2x1
jax: 0.10.0
libtpu: 0.0.40
codegen_flags: <defaults>
</compile_context>

<pallas_src>
import functools

import jax
import jax.numpy as jnp
import numpy as np
from jax.experimental import pallas as pl
from jax.experimental.pallas import tpu as pltpu


def _ctc_greedy_kernel(em_ref, prev_ref, out_ref, *, blank: int,
                       seq_len: int, tile_t: int):
    """One T-tile of greedy CTC decoding.

    em_ref   : [tile_t, C]  emission rows of this tile (native [T, C] layout)
    prev_ref : [128, C]     the 128 emission rows ending at this tile's start
                            (row 127 == last timestep of the previous tile);
                            clamped to rows [0,128) for tile 0 and ignored.
    out_ref  : [1, tile_t]  packed result: argmax index if kept, else -1.
    """
    i = pl.program_id(0)

    x = em_ref[...]                                    # [Tt, C], native dtype
    Tt, C = x.shape

    # --- transpose to class-on-sublanes / time-on-lanes, on the MXU --------
    # xt[c, t] = sum_k eye[c, k] * x[t, k] = x[t, c].  Contraction runs over
    # the class axis only, so garbage rows of a partial last tile can only
    # corrupt their own (masked-off) columns.  Exact widening for bf16 input.
    r = jax.lax.broadcasted_iota(jnp.int32, (C, C), 0)
    c = jax.lax.broadcasted_iota(jnp.int32, (C, C), 1)
    eye = (r == c).astype(x.dtype)
    xt = jax.lax.dot_general(eye, x, (((1,), (1,)), ((), ())),
                             preferred_element_type=jnp.float32)   # [C, Tt]

    # --- first-index argmax over classes (same tie rule as torch.argmax) ---
    row = jax.lax.broadcasted_iota(jnp.int32, (C, Tt), 0)
    mx = jnp.max(xt, axis=0, keepdims=True)            # [1, Tt]
    cand = jnp.where(xt == mx, row, jnp.int32(C))
    idx = jnp.min(cand, axis=0, keepdims=True)         # [1, Tt] int32
    idx = jnp.minimum(idx, jnp.int32(C - 1))           # all-NaN column guard

    # --- previous timestep's argmax for lane 0 of this tile -----------------
    # Recomputed from the re-read chunk instead of a serial carry so the grid
    # axis stays "parallel" (v7x megacore).  Row 127 == emission[i*Tt - 1, :].
    last = prev_ref[...][127:128, :]                    # [1, C]
    col = jax.lax.broadcasted_iota(jnp.int32, (1, C), 1)
    pmx = jnp.max(last, axis=1, keepdims=True)
    pcand = jnp.where(last == pmx, col, jnp.int32(C))
    pidx = jnp.minimum(jnp.min(pcand, axis=1, keepdims=True), jnp.int32(C - 1))
    pidx = jnp.where(i == 0, jnp.int32(-1), pidx)       # no timestep before 0

    # prev[t] = idx[t-1]; lane 0 comes from the previous tile's recomputed idx.
    rolled = pltpu.roll(idx, shift=1, axis=1)           # rolled[:,0]=idx[:,Tt-1]
    lane = jax.lax.broadcasted_iota(jnp.int32, (1, Tt), 1)
    prev = jnp.where(lane == 0, pidx, rolled)

    # unique_consecutive + blank removal + tail mask, packed into one stream.
    valid = (i * tile_t + lane) < seq_len
    keep = (idx != jnp.int32(blank)) & (idx != prev) & valid
    out_ref[...] = jnp.where(keep, idx, jnp.int32(-1))


def greedy_decode(emission: jax.Array, blank: int = 0,
                  tile_t: int = 8192) -> jax.Array:
    """Pallas greedy CTC decode of a [T, C] emission.

    Returns a packed int32 [T] array: the argmax class at positions kept by
    unique_consecutive / blank removal, -1 at dropped positions.
    """
    T, C = emission.shape

    # Time-tile: multiple of 128 lanes, at most ceil(T/128)*128, at least 128.
    tile_t = max(128, (int(tile_t) // 128) * 128)
    tile_t = min(tile_t, ((T + 127) // 128) * 128)
    num_tiles = pl.cdiv(T, tile_t)
    blocks_per_tile = tile_t // 128

    kernel = functools.partial(_ctc_greedy_kernel, blank=blank,
                               seq_len=T, tile_t=tile_t)
    out = pl.pallas_call(
        kernel,
        out_shape=jax.ShapeDtypeStruct((1, T), jnp.int32),
        grid=(num_tiles,),
        in_specs=[
            # main [tile_t, C] block of this tile
            pl.BlockSpec((tile_t, C), lambda i: (i, 0)),
            # 128 rows ending exactly at this tile's start (previous tile's
            # tail); clamped to block 0 for i == 0 and ignored in-kernel.
            pl.BlockSpec((128, C),
                         lambda i: (jnp.maximum(i * blocks_per_tile - 1, 0), 0)),
        ],
        out_specs=pl.BlockSpec((1, tile_t), lambda i: (0, i)),
        compiler_params=pltpu.CompilerParams(
            dimension_semantics=("parallel",),   # no cross-tile carry anymore
            vmem_limit_bytes=32 * 1024 * 1024,
        ),
    )(emission, emission)
    return out[0]


class Decoder:
    """JAX/Pallas port of the PyTorch greedy CTC Decoder module."""

    def __init__(self, labels, blank: int = 0):
        self.labels = labels
        self.blank = blank
        self._labels_arr = np.array(list(labels))

    def __call__(self, emission: jax.Array) -> str:
        packed = greedy_decode(emission, blank=self.blank)
        packed_np = np.asarray(jax.device_get(packed))   # single D2H transfer
        # TODO(synk): label lookup + string join has no Pallas equivalent;
        # done host-side (vectorized numpy mask + gather) from the packed
        # kernel output (-1 == dropped position).
        kept = packed_np[packed_np >= 0]
        if kept.size == 0:
            return ''
        return ''.join(self._labels_arr[kept].tolist())

    def decode(self, prediction: jax.Array) -> str:
        transcript = self(prediction)
        return transcript.lower().replace('|', ' ')


def _reference_decode(emission_np: np.ndarray, labels, blank: int) -> str:
    """Pure-Python reference matching the PyTorch forward exactly."""
    indices = emission_np.argmax(axis=-1)
    uniq = []
    prev = None
    for i in indices:
        if prev is None or i != prev:
            uniq.append(int(i))
        prev = i
    return ''.join(labels[i] for i in uniq if i != blank)


def _join(packed_np: np.ndarray, labels) -> str:
    labels_arr = np.array(list(labels))
    kept = packed_np[packed_np >= 0]
    return ''.join(labels_arr[kept].tolist()) if kept.size else ''


if __name__ == "__main__":
    # 32 labels, blank at index 0, '|' acts as word separator (torchaudio style)
    labels = "_|abcdefghijklmnopqrstuvwxyz'.?!"
    assert len(labels) == 32

    key = jax.random.PRNGKey(0)
    decoder = Decoder(labels, blank=0)

    # --- small demo shape consistent with the module: seq=8, 32 classes ----
    # (scores snapped to bf16-representable values so the MXU transpose path
    #  cannot introduce rounding-level argmax flips vs. the f32 reference)
    T, C = 8, 32
    emission = jax.random.normal(key, (T, C), dtype=jnp.float32)
    emission = emission.astype(jnp.bfloat16).astype(jnp.float32)

    packed = greedy_decode(emission, blank=0)
    jax.block_until_ready(packed)

    transcript = decoder(emission)
    ref = _reference_decode(np.asarray(jax.device_get(emission)), labels, 0)
    assert transcript == ref, f"mismatch: kernel={transcript!r} ref={ref!r}"
    assert decoder.decode(emission) == ref.lower().replace('|', ' ')

    # --- longer sequence: many consecutive duplicates / blanks --------------
    T2 = 700
    k1, k2 = jax.random.split(key)
    ids = jax.random.randint(k1, (T2,), 0, 8)
    noise = 0.01 * jax.random.normal(k2, (T2, C), dtype=jnp.float32)
    emission2 = jax.nn.one_hot(ids, C, dtype=jnp.float32) * 5.0 + noise
    emission2 = emission2.astype(jnp.bfloat16).astype(jnp.float32)
    ref2 = _reference_decode(np.asarray(jax.device_get(emission2)), labels, 0)

    # single-tile path (default tile clamped to 768)
    transcript2 = decoder(emission2)
    assert transcript2 == ref2, f"mismatch: kernel={transcript2!r} ref={ref2!r}"

    # multi-tile path (3 tiles of 256, last one partial) to exercise the
    # cross-tile prev-index re-read and the in-kernel tail masking
    packed2 = greedy_decode(emission2, blank=0, tile_t=256)
    jax.block_until_ready(packed2)
    transcript2_mt = _join(np.asarray(jax.device_get(packed2)), labels)
    assert transcript2_mt == ref2, (
        f"mismatch (multi-tile): kernel={transcript2_mt!r} ref={ref2!r}")

    print("KERNEL_OK")
</pallas_src>

<mosaic_0001>
module attributes {stable_mosaic.version = 11 : i64} {
  func.func @_ctc_greedy_kernel(%arg0: i32, %arg1: memref<128x32xf32, #tpu.memory_space<vmem>>, %arg2: memref<128x32xf32, #tpu.memory_space<vmem>>, %arg3: memref<1x128xi32, #tpu.memory_space<vmem>>) attributes {dimension_semantics = [#tpu.dimension_semantics<parallel>], iteration_bounds = array<i64: 1>, scalar_prefetch = 0 : i64, scratch_operands = 0 : i64, tpu.core_type = #tpu.core_type<tc>, window_params = [{transform_indices = @transform_0, window_bounds = array<i64: 128, 32>}, {transform_indices = @transform_1, window_bounds = array<i64: 128, 32>}, {transform_indices = @transform_2, window_bounds = array<i64: 1, 128>}]} {
    %c0 = arith.constant 0 : index
    %c0_0 = arith.constant 0 : index
    %0 = vector.load %arg1[%c0, %c0_0] : memref<128x32xf32, #tpu.memory_space<vmem>>, vector<128x32xf32>
    %1 = tpu.iota {dimensions = array<i32: 0>} : vector<32x32xi32>
    %2 = tpu.iota {dimensions = array<i32: 1>} : vector<32x32xi32>
    %3 = arith.cmpi eq, %1, %2 : vector<32x32xi32>
    %4 = arith.extui %3 : vector<32x32xi1> to vector<32x32xi32>
    %5 = arith.sitofp %4 : vector<32x32xi32> to vector<32x32xf32>
    %cst = arith.constant dense<0.000000e+00> : vector<32x128xf32>
    %6 = tpu.matmul %5, %0, %cst {dimension_numbers = #tpu.dot_dimension_numbers<[1], [1], [0], [0], [0, 0, 1, 0], [], []>} : vector<32x32xf32>, vector<128x32xf32>, vector<32x128xf32> -> vector<32x128xf32>
    %7 = tpu.iota {dimensions = array<i32: 0>} : vector<32x128xi32>
    %cst_1 = arith.constant dense<0xFF800000> : vector<128xf32>
    %8 = vector.multi_reduction <maximumf>, %6, %cst_1 [0] : vector<32x128xf32> to vector<128xf32>
    %9 = vector.shape_cast %8 : vector<128xf32> to vector<1x128xf32>
    %10 = vector.broadcast %9 : vector<1x128xf32> to vector<32x128xf32>
    %11 = arith.cmpf oeq, %6, %10 : vector<32x128xf32>
    %c32_i32 = arith.constant 32 : i32
    %12 = vector.broadcast %c32_i32 : i32 to vector<32x128xi32>
    %13 = arith.select %11, %7, %12 : vector<32x128xi1>, vector<32x128xi32>
    %cst_2 = arith.constant dense<2147483647> : vector<128xi32>
    %14 = vector.multi_reduction <minsi>, %13, %cst_2 [0] : vector<32x128xi32> to vector<128xi32>
    %15 = vector.shape_cast %14 : vector<128xi32> to vector<1x128xi32>
    %c31_i32 = arith.constant 31 : i32
    %16 = vector.broadcast %c31_i32 : i32 to vector<1x128xi32>
    %17 = arith.minsi %15, %16 : vector<1x128xi32>
    %c0_3 = arith.constant 0 : index
    %c0_4 = arith.constant 0 : index
    %18 = vector.load %arg2[%c0_3, %c0_4] : memref<128x32xf32, #tpu.memory_space<vmem>>, vector<128x32xf32>
    %19 = vector.extract_strided_slice %18 {offsets = [127, 0], sizes = [1, 32], strides = [1, 1]} : vector<128x32xf32> to vector<1x32xf32>
    %20 = tpu.iota {dimensions = array<i32: 1>} : vector<1x32xi32>
    %cst_5 = arith.constant dense<0xFF800000> : vector<1xf32>
    %21 = vector.multi_reduction <maximumf>, %19, %cst_5 [1] : vector<1x32xf32> to vector<1xf32>
    %22 = vector.shape_cast %21 : vector<1xf32> to vector<1x1xf32>
    %23 = vector.broadcast %22 : vector<1x1xf32> to vector<1x32xf32>
    %24 = arith.cmpf oeq, %19, %23 : vector<1x32xf32>
    %c32_i32_6 = arith.constant 32 : i32
    %25 = vector.broadcast %c32_i32_6 : i32 to vector<1x32xi32>
    %26 = arith.select %24, %20, %25 : vector<1x32xi1>, vector<1x32xi32>
    %cst_7 = arith.constant dense<2147483647> : vector<1xi32>
    %27 = vector.multi_reduction <minsi>, %26, %cst_7 [1] : vector<1x32xi32> to vector<1xi32>
    %28 = vector.shape_cast %27 : vector<1xi32> to vector<1x1xi32>
    %c31_i32_8 = arith.constant 31 : i32
    %29 = vector.broadcast %c31_i32_8 : i32 to vector<1x1xi32>
    %30 = arith.minsi %28, %29 : vector<1x1xi32>
    %c0_i32 = arith.constant 0 : i32
    %31 = arith.cmpi eq, %arg0, %c0_i32 : i32
    %c-1_i32 = arith.constant -1 : i32
    %32 = vector.broadcast %c-1_i32 : i32 to vector<1x1xi32>
    %33 = arith.select %31, %32, %30 : vector<1x1xi32>
    %c1_i32 = arith.constant 1 : i32
    %34 = tpu.dynamic_rotate %17 by %c1_i32 dim 1 : vector<1x128xi32>, i32 -> vector<1x128xi32>
    %35 = tpu.iota {dimensions = array<i32: 1>} : vector<1x128xi32>
    %c0_i32_9 = arith.constant 0 : i32
    %36 = vector.broadcast %c0_i32_9 : i32 to vector<1x128xi32>
    %37 = arith.cmpi eq, %35, %36 : vector<1x128xi32>
    %38 = vector.shape_cast %33 : vector<1x1xi32> to vector<1x1xi32>
    %39 = vector.broadcast %38 : vector<1x1xi32> to vector<1x128xi32>
    %40 = arith.select %37, %39, %34 : vector<1x128xi1>, vector<1x128xi32>
    %c128_i32 = arith.constant 128 : i32
    %41 = arith.muli %arg0, %c128_i32 : i32
    %42 = vector.broadcast %41 : i32 to vector<1x128xi32>
    %43 = arith.addi %42, %35 : vector<1x128xi32>
    %c8_i32 = arith.constant 8 : i32
    %44 = vector.broadcast %c8_i32 : i32 to vector<1x128xi32>
    %45 = arith.cmpi slt, %43, %44 : vector<1x128xi32>
    %c0_i32_10 = arith.constant 0 : i32
    %46 = vector.broadcast %c0_i32_10 : i32 to vector<1x128xi32>
    %47 = arith.cmpi ne, %17, %46 : vector<1x128xi32>
    %48 = arith.cmpi ne, %17, %40 : vector<1x128xi32>
    %49 = arith.andi %47, %48 : vector<1x128xi1>
    %50 = arith.andi %49, %45 : vector<1x128xi1>
    %c-1_i32_11 = arith.constant -1 : i32
    %51 = vector.broadcast %c-1_i32_11 : i32 to vector<1x128xi32>
    %52 = arith.select %50, %17, %51 : vector<1x128xi1>, vector<1x128xi32>
    %c0_12 = arith.constant 0 : index
    %c0_13 = arith.constant 0 : index
    %53 = vector.load %arg3[%c0_12, %c0_13] : memref<1x128xi32, #tpu.memory_space<vmem>>, vector<1x128xi32>
    tpu.vector_store %arg3[%c0_12, %c0_13], %52 {strides = array<i32>} : memref<1x128xi32, #tpu.memory_space<vmem>>, vector<1x128xi32>,
    return
  }
  func.func @transform_0(%arg0: i32) -> (i32, i32) {
    %c0_i32 = arith.constant 0 : i32
    %c0_i32_0 = arith.constant 0 : i32
    return %arg0, %c0_i32 : i32, i32
  }
  func.func @transform_1(%arg0: i32) -> (i32, i32) {
    %c1_i32 = arith.constant 1 : i32
    %0 = arith.muli %arg0, %c1_i32 : i32
    %c1_i32_0 = arith.constant 1 : i32
    %1 = arith.subi %0, %c1_i32_0 : i32
    %c0_i32 = arith.constant 0 : i32
    %2 = arith.maxsi %1, %c0_i32 : i32
    %c0_i32_1 = arith.constant 0 : i32
    %c0_i32_2 = arith.constant 0 : i32
    return %2, %c0_i32_1 : i32, i32
  }
  func.func @transform_2(%arg0: i32) -> (i32, i32) {
    %c0_i32 = arith.constant 0 : i32
    %c0_i32_0 = arith.constant 0 : i32
    return %c0_i32, %arg0 : i32, i32
  }
}

</mosaic_0001>

<bundles_post_ra>
// kernel: tpu_custom_call.1
= control target key start
LH: loop header
LB: loop body
LE: loop exit
PB: predicated region body
PF: predicated region fallthrough
CT: control target
= control target key end

     0   :  { %7 = vsyncpa [#allocation3], 0  ;;  %s713_s0 = inlined_call_operand.hbm [shape: f32[8,32], index: 0, kind: input, shape index: {}]   ;;  %s714_s1 = inlined_call_operand.hbm [shape: f32[8,32], index: 1, kind: input, shape index: {}]   ;;  %s715_s2 = inlined_call_operand.hbm [shape: s32[1,8], index: 2, kind: output, shape index: {}]  }
   0x1   :  { %8 = vsyncpa [#allocation6], 0 }
   0x2   :  { %9 = vsyncpa [#allocation4], 0 }
   0x3   :  { %14 = vsyncadd [#allocation3], 1920  ;;  %s558_s9 = smov [#allocation2]   ;;  %s486_s13 = scalar_lea.hbm %s713_s0, 128 }
   0x4   :  { %s15_s10 = sshll.u32 %s558_s9, 4  ;;  %p487_p0 = scmp.ne.s32.totalorder %s713_s0, %s486_s13  ;;  %s16_s10 = int_to_ptr.vmem [resolvable:$true] %s15_s10 }
   0x5   :  { %p490_p1 = scmp.lt.u32.totalorder %s486_s13, %s713_s0 }
   0x7   :  { %p492_p2 = pnand %p490_p1, %p487_p0 }
   0x9   :  { %495 = shalt.err (!%p492_p2)
}
   0xa   :  { %s496_s18 = scalar_lea.vmem %s16_s10, 128  ;;  %s500_s19 = scalar_lea.vmem %s16_s10, 2048 }
   0xb   :  { %p497_p3 = scmp.ne.s32.totalorder %s16_s10, %s496_s18  ;;  %p501_p4 = scmp.lt.s32.totalorder %s16_s10, %s16_s10 }
   0xc   :  { %p502_p5 = scmp.lt.s32.totalorder %s500_s19, %s496_s18 }
   0xe   :  { %p503_p6 = por %p502_p5, %p501_p4 }
  0x10   :  { %p504_p7 = pnand %p503_p6, %p497_p3 }
  0x12   :  { %507 = shalt.err (!%p504_p7)
}
  0x13   :  { %s559_s20 = smov 128   ;;  %s560_s21 = smov 8  }
  0x14   :  { %21 = dma.hbm_to_vmem [thread:$0]  %s713_s0, 128, %s16_s10, [#allocation3], %s559_s20, %s559_s20, %s560_s21  }
  0x15   :  { %32 = vsyncadd [#allocation6], 1920  ;;  %s561_s24 = smov [#allocation5]   ;;  %s508_s28 = scalar_lea.hbm %s714_s1, 128 }
  0x16   :  { %s37_s25 = sshll.u32 %s561_s24, 4  ;;  %p509_p8 = scmp.ne.s32.totalorder %s714_s1, %s508_s28  ;;  %s38_s25 = int_to_ptr.vmem [resolvable:$true] %s37_s25 }
  0x17   :  { %p512_p9 = scmp.lt.u32.totalorder %s508_s28, %s714_s1 }
  0x19   :  { %p514_p10 = pnand %p512_p9, %p509_p8 }
  0x1b   :  { %517 = shalt.err (!%p514_p10)
}
  0x1c   :  { %s518_s5 = scalar_lea.vmem %s38_s25, 128  ;;  %s522_s0 = scalar_lea.vmem %s38_s25, 2048 }
  0x1d   :  { %p519_p11 = scmp.ne.s32.totalorder %s38_s25, %s518_s5  ;;  %p523_p12 = scmp.lt.s32.totalorder %s38_s25, %s38_s25 }
  0x1e   :  { %p524_p13 = scmp.lt.s32.totalorder %s522_s0, %s518_s5 }
  0x20   :  { %p525_p0 = por %p524_p13, %p523_p12 }
  0x22   :  { %p526_p1 = pnand %p525_p0, %p519_p11 }
  0x24   :  { %529 = shalt.err (!%p526_p1)
}
  0x25   :  { %43 = dma.hbm_to_vmem [thread:$0]  %s714_s1, 128, %s38_s25, [#allocation6], %s559_s20, %s559_s20, %s560_s21  }
  0x26   :  { %552 = dma.done.wait [#allocation3], 2048  }
  0x27   :  { %553 = vsyncadd [#allocation3], 4294965248 }
  0x28   :  { %554 = dma.done.wait [#allocation6], 2048  }
  0x29   :  { %555 = vsyncadd [#allocation6], 4294965248  ;;  %v72_v0 = vlaneseq  ;;  %vm91_vm0 = vcmask 261120   ;;  %v562_v4 = vmov 0.0   ;;  %v56_v7 = vld [vmem:[#allocation2] sm:$0xff]  ;;  %v57_v8 = vld [vmem:[#allocation2 + $0x8] sm:$0xff] }
  0x2a   :  { %vm616_vm2 = vmpackc.low %vm91_vm0, %vm91_vm0  ;;  %v58_v9 = vld [vmem:[#allocation2 + $0x10] sm:$0xff]  ;;  %v415_v11 = vpack.c.bf16 %v57_v8, %v56_v7  ;;  %v59_v12 = vld [vmem:[#allocation2 + $0x18] sm:$0xff]  ;;  %s563_s1 = smov 1   ;;  %s564_s8 = smov [#allocation7]  }
  0x2b   :  { %v604_v1 = vshrl.u32 %v72_v0, 7  ;;  %v606_v2 = vand.u32 127, %v72_v0  ;;  %v421_v13 = vpack.c.bf16 %v59_v12, %v58_v9  ;;  %v60_v14 = vld [vmem:[#allocation2 + $0x20] sm:$0xff]  ;;  %v61_v15 = vld [vmem:[#allocation2 + $0x28] sm:$0xff]  ;;  %v62_v17 = vld [vmem:[#allocation2 + $0x30] sm:$0xff]  ;;  %s321_s9 = sshll.u32 %s564_s8, 4  ;;  %s322_s9 = int_to_ptr.vmem [resolvable:$true] %s321_s9 }
  0x2c   :  { %417 = vmatprep.subr.msk.bf16.mxu0 %vm616_vm2, %v415_v11  ;;  %463 = vmatprep.subr.msk.bf16.mxu1 %vm616_vm2, %v415_v11  ;;  %v427_v16 = vpack.c.bf16 %v61_v15, %v60_v14  ;;  %v63_v18 = vld [vmem:[#allocation2 + $0x38] sm:$0xff]  ;;  %v64_v20 = vld [vmem:[#allocation2 + $0x40] sm:$0xff]  ;;  %v65_v21 = vld [vmem:[#allocation2 + $0x48] sm:$0xff]  ;;  %s530_s10 = scalar_lea.vmem %s322_s9, 16  ;;  %s534_s11 = scalar_lea.vmem %s322_s9, 32 }
  0x2d   :  { %vm79_vm1 = vcmp.eq.s32.totalorder %v604_v1, %v606_v2  ;;  %v611_v3 = vadd.s32 16, %v604_v1  ;;  %420 = vmatpush3.bf16.xpose.msk.msra.mxu0 %vm616_vm2, %v415_v11  ;;  %471 = vmatpush3.bf16.xpose.msk.msra.mxu1 %vm616_vm2, %v415_v11  ;;  %v433_v19 = vpack.c.bf16 %v63_v18, %v62_v17  ;;  %v439_v22 = vpack.c.bf16 %v65_v21, %v64_v20  ;;  %v66_v23 = vld [vmem:[#allocation2 + $0x50] sm:$0xff]  ;;  %v67_v24 = vld [vmem:[#allocation2 + $0x58] sm:$0xff]  ;;  %v68_v26 = vld [vmem:[#allocation2 + $0x60] sm:$0xff]  ;;  %p531_p2 = scmp.ne.s32.totalorder %s322_s9, %s530_s10  ;;  %p535_p3 = scmp.lt.s32.totalorder %s322_s9, %s322_s9 }
  0x2e   :  { %v333_v5 = vsel %vm79_vm1, 1.0, %v562_v4  ;;  %423 = vmatprep.subr.msk.bf16.mxu0 %vm616_vm2, %v421_v13  ;;  %464 = vmatprep.subr.msk.bf16.mxu1 %vm616_vm2, %v421_v13  ;;  %v445_v25 = vpack.c.bf16 %v67_v24, %v66_v23  ;;  %v69_v27 = vld [vmem:[#allocation2 + $0x68] sm:$0xff]  ;;  %v70_v29 = vld [vmem:[#allocation2 + $0x70] sm:$0xff]  ;;  %v71_v30 = vld [vmem:[#allocation2 + $0x78] sm:$0xff]  ;;  %v74_v32 = vadd.s32 8, %v604_v1  ;;  %v76_v33 = vadd.s32 24, %v604_v1  ;;  %p536_p4 = scmp.lt.s32.totalorder %s534_s11, %s530_s10 }
  0x2f   :  { %409 = vmatprep.mubr.msk.f32.mxu0 %vm91_vm0, %v333_v5  ;;  %vm81_vm3 = vcmp.eq.s32.totalorder %v611_v3, %v606_v2  ;;  %v451_v28 = vpack.c.bf16 %v69_v27, %v68_v26  ;;  %v457_v31 = vpack.c.bf16 %v71_v30, %v70_v29  ;;  %vm302_vm1 = vcmp.eq.s32.totalorder %v606_v2, 0 }
  0x30   :  { %v335_v10 = vsel %vm81_vm3, 1.0, %v562_v4  ;;  %vm80_vm4 = vcmp.eq.s32.totalorder %v74_v32, %v606_v2  ;;  %vm82_vm5 = vcmp.eq.s32.totalorder %v76_v33, %v606_v2  ;;  %p537_p5 = por %p536_p4, %p535_p3 }
  0x31   :  { %412 = vmatprep.mubr.msk.f32.mxu1 %vm91_vm0, %v335_v10  ;;  %v334_v34 = vsel %vm80_vm4, 1.0, %v562_v4  ;;  %v336_v35 = vsel %vm82_vm5, 1.0, %v562_v4 }
  0x32   :  { %p538_p6 = pnand %p537_p5, %p531_p2 }
  0x35   :  { %426 = vmatpush3.bf16.xpose.msk.msra.mxu0 %vm616_vm2, %v421_v13  ;;  %472 = vmatpush3.bf16.xpose.msk.msra.mxu1 %vm616_vm2, %v421_v13 }
  0x36   :  { %429 = vmatprep.subr.msk.bf16.mxu0 %vm616_vm2, %v427_v16  ;;  %465 = vmatprep.subr.msk.bf16.mxu1 %vm616_vm2, %v427_v16 }
  0x3d   :  { %432 = vmatpush3.bf16.xpose.msk.msra.mxu0 %vm616_vm2, %v427_v16  ;;  %473 = vmatpush3.bf16.xpose.msk.msra.mxu1 %vm616_vm2, %v427_v16 }
  0x3e   :  { %435 = vmatprep.subr.msk.bf16.mxu0 %vm616_vm2, %v433_v19  ;;  %466 = vmatprep.subr.msk.bf16.mxu1 %vm616_vm2, %v433_v19 }
  0x45   :  { %438 = vmatpush3.bf16.xpose.msk.msra.mxu0 %vm616_vm2, %v433_v19  ;;  %474 = vmatpush3.bf16.xpose.msk.msra.mxu1 %vm616_vm2, %v433_v19 }
  0x46   :  { %441 = vmatprep.subr.msk.bf16.mxu0 %vm616_vm2, %v439_v22  ;;  %467 = vmatprep.subr.msk.bf16.mxu1 %vm616_vm2, %v439_v22 }
  0x4d   :  { %444 = vmatpush3.bf16.xpose.msk.msra.mxu0 %vm616_vm2, %v439_v22  ;;  %475 = vmatpush3.bf16.xpose.msk.msra.mxu1 %vm616_vm2, %v439_v22 }
  0x4e   :  { %447 = vmatprep.subr.msk.bf16.mxu0 %vm616_vm2, %v445_v25  ;;  %468 = vmatprep.subr.msk.bf16.mxu1 %vm616_vm2, %v445_v25 }
  0x55   :  { %450 = vmatpush3.bf16.xpose.msk.msra.mxu0 %vm616_vm2, %v445_v25  ;;  %476 = vmatpush3.bf16.xpose.msk.msra.mxu1 %vm616_vm2, %v445_v25 }
  0x56   :  { %453 = vmatprep.subr.msk.bf16.mxu0 %vm616_vm2, %v451_v28  ;;  %469 = vmatprep.subr.msk.bf16.mxu1 %vm616_vm2, %v451_v28 }
  0x5d   :  { %456 = vmatpush3.bf16.xpose.msk.msra.mxu0 %vm616_vm2, %v451_v28  ;;  %477 = vmatpush3.bf16.xpose.msk.msra.mxu1 %vm616_vm2, %v451_v28 }
  0x5e   :  { %459 = vmatprep.subr.msk.bf16.mxu0 %vm616_vm2, %v457_v31  ;;  %470 = vmatprep.subr.msk.bf16.mxu1 %vm616_vm2, %v457_v31 }
  0x65   :  { %462 = vmatpush3.bf16.xpose.msk.msra.mxu0 %vm616_vm2, %v457_v31  ;;  %478 = vmatpush3.bf16.xpose.msk.msra.mxu1 %vm616_vm2, %v457_v31  ;;  %vm308_vm2 = vcmp.lt.s32.totalorder %v606_v2, 8 }
  0x6c   :  { %410 = vmatmul.mubr.msk.f32.vlgmr.msra.gmra.mrb[0].mxu0 %vm91_vm0, %v334_v34  ;;  %413 = vmatmul.mubr.msk.f32.vlgmr.msra.gmra.mrb[0].mxu1 %vm91_vm0, %v336_v35 }
 0x13f   :  { %v411_v36 = vpop.f32.mrb[0].mxu0  ;;  %v414_v37 = vpop.f32.mrb[0].mxu1 }
 0x140   :  { %v218_v38 = vpop.f32.mrb[1].mxu0  ;;  %v228_v39 = vpop.f32.mrb[1].mxu1 }
 0x141   :  { %v237_v40 = vmax.f32 %v218_v38, %v411_v36  ;;  %v238_v41 = vmax.f32 %v228_v39, %v414_v37 }
 0x143   :  { %v239_v42 = vmax.f32 %v237_v40, %v238_v41 }
 0x145   :  { %v240_v43 = vrot.slane %v239_v42, 4 }
 0x147   :  { %v241_v44 = vmax.f32 %v239_v42, %v240_v43 }
 0x149   :  { %v242_v45 = vrot.slane %v241_v44, 2 }
 0x14b   :  { %v243_v46 = vmax.f32 %v241_v44, %v242_v45 }
 0x14d   :  { %v244_v47 = vrot.slane %v243_v46, 1 }
 0x14f   :  { %v245_v48 = vmax.f32 %v243_v46, %v244_v47 }
 0x151   :  { %vm246_vm6 = vcmp.eq.f32.partialorder %v218_v38, %v245_v48  ;;  %vm247_vm7 = vcmp.eq.f32.partialorder %v411_v36, %v245_v48  ;;  %vm248_vm8 = vcmp.eq.f32.partialorder %v228_v39, %v245_v48  ;;  %vm249_vm9 = vcmp.eq.f32.partialorder %v414_v37, %v245_v48 }
 0x152   :  { %v250_v49 = vsel %vm246_vm6, %v604_v1, 32  ;;  %v251_v50 = vsel %vm247_vm7, %v74_v32, 32  ;;  %v252_v51 = vsel %vm248_vm8, %v611_v3, 32  ;;  %v253_v52 = vsel %vm249_vm9, %v76_v33, 32 }
 0x153   :  { %vm254_vm10 = vcmp.lt.s32.totalorder %v250_v49, %v251_v50  ;;  %vm256_vm11 = vcmp.lt.s32.totalorder %v252_v51, %v253_v52 }
 0x154   :  { %v255_v53 = vsel %vm254_vm10, %v250_v49, %v251_v50  ;;  %v257_v54 = vsel %vm256_vm11, %v252_v51, %v253_v52 }
 0x155   :  { %vm258_vm12 = vcmp.lt.s32.totalorder %v255_v53, %v257_v54 }
 0x156   :  { %v259_v55 = vsel %vm258_vm12, %v255_v53, %v257_v54 }
 0x157   :  { %v260_v56 = vrot.slane %v259_v55, 4 }
 0x159   :  { %vm261_vm13 = vcmp.lt.s32.totalorder %v259_v55, %v260_v56 }
 0x15a   :  { %v262_v57 = vsel %vm261_vm13, %v259_v55, %v260_v56 }
 0x15b   :  { %v263_v58 = vrot.slane %v262_v57, 2 }
 0x15d   :  { %vm264_vm14 = vcmp.lt.s32.totalorder %v262_v57, %v263_v58 }
 0x15e   :  { %v265_v59 = vsel %vm264_vm14, %v262_v57, %v263_v58 }
 0x15f   :  { %v266_v60 = vrot.slane %v265_v59, 1 }
 0x161   :  { %vm267_vm15 = vcmp.lt.s32.totalorder %v265_v59, %v266_v60 }
 0x162   :  { %v268_v61 = vsel %vm267_vm15, %v265_v59, %v266_v60 }
 0x163   :  { %vm269_vm0 = vcmp.lt.s32.totalorder %v268_v61, 31 }
 0x164   :  { %v270_v62 = vsel %vm269_vm0, %v268_v61, 31 }
 0x165   :  { %300 = vrot.lane.b32.xlu0 %v270_v62, %s563_s1  ;;  %vm309_vm3 = vcmp.ne.s32.totalorder %v270_v62, 0 }
 0x1d7   :  { %v301_v63 = vpop.permute.xlu0 %300 }
 0x1d8   :  { %v303_v0 = vrot.slane %v301_v63, 1 }
 0x1da   :  { %v304_v1 = vsel %vm302_vm1, 4294967295, %v303_v0 }
 0x1db   :  { %vm310_vm4 = vcmp.ne.s32.totalorder %v270_v62, %v304_v1 }
 0x1dc   :  { %vm311_vm5 = vmand %vm309_vm3, %vm310_vm4 }
 0x1dd   :  { %vm312_vm6 = vmand %vm311_vm5, %vm308_vm2 }
 0x1de   :  { %v313_v3 = vsel %vm312_vm6, %v270_v62, 4294967295 }
 0x1df   :  { %314 = vst [vmem:[#allocation7 - $0x7] sm:$0x80] %v313_v3 }
 0x1e0   :  { %541 = shalt.err (!%p538_p6)
}
 0x1e1   :  { %s542_s14 = scalar_lea.hbm %s715_s2, 16 }
 0x1e2   :  { %p543_p7 = scmp.ne.s32.totalorder %s715_s2, %s542_s14  ;;  %p546_p8 = scmp.lt.u32.totalorder %s542_s14, %s715_s2 }
 0x1e4   :  { %p548_p9 = pnand %p546_p8, %p543_p7 }
 0x1e6   :  { %551 = shalt.err (!%p548_p9)
}
 0x1e7   :  { %324 = dma.vmem_to_hbm [thread:$0]  %s322_s9, 16, %s715_s2, [#allocation4]  }
 0x1e8   :  { %556 = dma.done.wait [#allocation4], 16  }
 0x1e9   :  { %557 = vsyncadd [#allocation4], 4294967280 }
 0x1ea   :  { %328 = vsyncpa [#allocation3], 1 }
 0x1eb   :  { %329 = vsyncpa [#allocation6], 1 }
 0x1ec   :  { %330 = vsyncpa [#allocation4], 1 }

</bundles_post_ra>
